<compile_context>
chip_gen: v7x
topology: tpu7x:2x2x1
jax: 0.10.0
libtpu: 0.0.40
codegen_flags: <defaults>
</compile_context>

<pallas_src>
import functools

import jax
import jax.numpy as jnp
from jax.experimental import pallas as pl
from jax.experimental.pallas import tpu as pltpu


# --------------------------- kernel body -------------------------------------
def _cnn_highway_kernel(x_ref, wconv_ref, bconv_ref, whw_ref, bhw_ref, out_ref, *, lp):
    # Shapes seen by the kernel (modality axis squeezed away by the BlockSpec):
    #   x_ref:     (rb*Lp, Kp)   bf16   (wrapper-built lane-dense im2col slab)
    #   wconv_ref: (Kp, Fp)      bf16
    #   bconv_ref: (1, Fp)       f32
    #   whw_ref:   (Fp, 2*Fp)    bf16   ([projection | gate] fused)
    #   bhw_ref:   (1, 2*Fp)     f32
    #   out_ref:   (rb, Fp)      f32
    rb, fp = out_ref.shape

    # Conv1d(valid, kernel=k) folded into one MXU pass.
    conv = jnp.dot(x_ref[...], wconv_ref[...],
                   preferred_element_type=jnp.float32)            # (rb*Lp, Fp)

    # Full-length MaxPool1d over the (tile-aligned) conv axis; bias after max.
    pooled = (jnp.max(conv.reshape(rb, lp, fp), axis=1)
              + bconv_ref[...])                                   # (rb, Fp) f32

    # Highway: fused [proj | gate] matmul, blend in f32.
    hw = (jnp.dot(pooled.astype(jnp.bfloat16), whw_ref[...],
                  preferred_element_type=jnp.float32)
          + bhw_ref[...])                                         # (rb, 2*Fp)
    proj = hw[:, :fp]
    gate = jax.nn.sigmoid(hw[:, fp:])
    hwy = gate * proj + (1.0 - gate) * pooled

    # TODO(synk): nn.Dropout(p=0.3) is applied as identity (eval-mode semantics).
    out_ref[...] = hwy.astype(out_ref.dtype)


# --------------------------- wrapper helpers ----------------------------------
def _im2col(x, k, lp):
    """(B,S,W,E) -> (B*S*lp, k*E): k shifted windows concatenated along features,
    pooled axis padded from L to lp by duplicating window 0 (max-invariant)."""
    B, S, W, E = x.shape
    L = W - k + 1
    xcat = jnp.concatenate([x[:, :, j:j + L, :] for j in range(k)], axis=-1)  # (B,S,L,k*E)
    if lp > L:
        dup = jnp.broadcast_to(xcat[:, :, :1, :], (B, S, lp - L, k * E))
        xcat = jnp.concatenate([xcat, dup], axis=2)
    return xcat.reshape(B * S * lp, k * E)


def _pick_row_block(rows_p, lp, kp):
    """Whole-rows block for small problems; 512/256-row tiles once rows scale.
    At rb=512, Lp=16, Kp=Fp=128 the resident blocks are ~2 MiB (bf16 slab) +
    ~4 MiB (f32 conv temp) -> comfortably inside v7x's 64 MiB VMEM."""
    if rows_p <= 512:
        return rows_p
    for cand in (512, 256):
        if rows_p % cand == 0:
            return cand
    return rows_p


def multi_cnn_transformer_forward(inputs, params, mods, *, k=2):
    """Pallas equivalent of MultiCNNTransformer.forward per-modality embeddings.
    inputs[mod]: (B, S, W, E_mod) -> outputs[mod]: (B, S, F_mod)."""
    n_mods = len(mods)
    B, S, W, _ = inputs[mods[0]].shape
    for mod in mods:
        assert inputs[mod].shape[:3] == (B, S, W), "modalities must share (B,S,W)"

    L = W - k + 1
    assert L >= 1
    Lp = ((L + 7) // 8) * 8                          # sublane-aligned pooled axis
    Fs = {mod: params[mod]['wconv'].shape[-1] for mod in mods}
    KEs = {mod: k * inputs[mod].shape[-1] for mod in mods}
    Fp = ((max(Fs.values()) + 127) // 128) * 128     # common lane-dense feature width
    Kp = ((max(KEs.values()) + 127) // 128) * 128    # common lane-dense contraction width
    rows = B * S
    rows_p = ((rows + 7) // 8) * 8

    xs, wcs, bcs, whs, bhs = [], [], [], [], []
    for mod in mods:
        E = inputs[mod].shape[-1]
        F = Fs[mod]
        p = params[mod]
        slab = _im2col(inputs[mod].astype(jnp.float32), k, Lp)          # (rows*Lp, k*E)
        slab = jnp.pad(slab, ((0, (rows_p - rows) * Lp), (0, Kp - k * E)))
        xs.append(slab.astype(jnp.bfloat16))
        wc = jnp.pad(p['wconv'].reshape(k * E, F), ((0, Kp - k * E), (0, Fp - F)))
        wcs.append(wc.astype(jnp.bfloat16))
        bcs.append(jnp.pad(p['bconv'], ((0, 0), (0, Fp - F))).astype(jnp.float32))
        wp = jnp.pad(p['wp'], ((0, Fp - F), (0, Fp - F)))
        wg = jnp.pad(p['wg'], ((0, Fp - F), (0, Fp - F)))
        whs.append(jnp.concatenate([wp, wg], axis=-1).astype(jnp.bfloat16))
        bp = jnp.pad(p['bp'], ((0, 0), (0, Fp - F)))
        bg = jnp.pad(p['bg'], ((0, 0), (0, Fp - F)))
        bhs.append(jnp.concatenate([bp, bg], axis=-1).astype(jnp.float32))

    X = jnp.stack(xs)        # (n_mods, rows_p*Lp, Kp)  bf16
    WC = jnp.stack(wcs)      # (n_mods, Kp, Fp)         bf16
    BC = jnp.stack(bcs)      # (n_mods, 1, Fp)          f32
    WH = jnp.stack(whs)      # (n_mods, Fp, 2*Fp)       bf16
    BH = jnp.stack(bhs)      # (n_mods, 1, 2*Fp)        f32

    rb = _pick_row_block(rows_p, Lp, Kp)
    grid = (n_mods, rows_p // rb)

    kernel = functools.partial(_cnn_highway_kernel, lp=Lp)
    out = pl.pallas_call(
        kernel,
        out_shape=jax.ShapeDtypeStruct((n_mods, rows_p, Fp), jnp.float32),
        grid=grid,
        in_specs=[
            pl.BlockSpec((pl.Squeezed(), rb * Lp, Kp), lambda m, r: (m, r, 0)),
            pl.BlockSpec((pl.Squeezed(), Kp, Fp), lambda m, r: (m, 0, 0)),
            pl.BlockSpec((pl.Squeezed(), 1, Fp), lambda m, r: (m, 0, 0)),
            pl.BlockSpec((pl.Squeezed(), Fp, 2 * Fp), lambda m, r: (m, 0, 0)),
            pl.BlockSpec((pl.Squeezed(), 1, 2 * Fp), lambda m, r: (m, 0, 0)),
        ],
        out_specs=pl.BlockSpec((pl.Squeezed(), rb, Fp), lambda m, r: (m, r, 0)),
        compiler_params=pltpu.CompilerParams(
            dimension_semantics=("parallel", "parallel")),
    )(X, WC, BC, WH, BH)

    outputs = {}
    for i, mod in enumerate(mods):
        F = Fs[mod]
        outputs[mod] = out[i, :rows, :F].reshape(B, S, F)
    # TODO(synk): UniTransformer / MultiTransformer head is not part of the
    # provided source; per-modality (B, S, window_embed_size) embeddings are
    # returned instead of the final Transformer prediction.
    return outputs


# ---------------- deterministic parameter init (synthetic, no checkpoint) ----
def init_mod_params(key, word_embed, window_embed, k=2):
    ks = jax.random.split(key, 6)
    F, E = window_embed, word_embed
    # PyTorch Conv1d weight: (F, E, k); stored transposed as (k, E, F).
    w_conv_pt = jax.random.normal(ks[0], (F, E, k), jnp.float32) * 0.05
    b_conv = jax.random.normal(ks[1], (F,), jnp.float32) * 0.05
    # PyTorch Linear weight: (F, F) applied as x @ W^T; store W^T directly.
    w_proj_pt = jax.random.normal(ks[2], (F, F), jnp.float32) * 0.05
    b_proj = jax.random.normal(ks[3], (F,), jnp.float32) * 0.05
    w_gate_pt = jax.random.normal(ks[4], (F, F), jnp.float32) * 0.05
    b_gate = jax.random.normal(ks[5], (F,), jnp.float32) * 0.05
    return {
        'wconv': jnp.transpose(w_conv_pt, (2, 1, 0)),   # (k, E, F)
        'bconv': b_conv.reshape(1, F),
        'wp': w_proj_pt.T, 'bp': b_proj.reshape(1, F),
        'wg': w_gate_pt.T, 'bg': b_gate.reshape(1, F),
    }


# ---------------- pure-JAX reference (same bf16 MXU operands) -----------------
def _ref_mod(x, p, k=2):
    B, S, W, E = x.shape
    F = p['wconv'].shape[-1]
    L = W - k + 1
    xcat = jnp.concatenate([x[:, :, j:j + L, :] for j in range(k)], axis=-1)  # (B,S,L,k*E)
    wflat = p['wconv'].reshape(k * E, F)
    conv = jnp.einsum('bslc,cf->bslf',
                      xcat.astype(jnp.bfloat16), wflat.astype(jnp.bfloat16),
                      preferred_element_type=jnp.float32) + p['bconv']
    pooled = jnp.max(conv, axis=2)                                            # (B,S,F)
    proj = jnp.dot(pooled.astype(jnp.bfloat16), p['wp'].astype(jnp.bfloat16),
                   preferred_element_type=jnp.float32) + p['bp']
    gate = jax.nn.sigmoid(
        jnp.dot(pooled.astype(jnp.bfloat16), p['wg'].astype(jnp.bfloat16),
                preferred_element_type=jnp.float32) + p['bg'])
    return gate * proj + (1.0 - gate) * pooled


if __name__ == "__main__":
    key = jax.random.PRNGKey(0)

    mods = ["audio", "text"]
    dims = {"audio": 32, "text": 48}          # per-mod word_embed_size
    embed_dims = {"audio": 32, "text": 64}    # per-mod window_embed_size
    B, S, W, k = 2, 8, 16, 2                  # batch, seq_len, window_len, conv kernel

    k_in, k_par = jax.random.split(key)
    in_keys = jax.random.split(k_in, len(mods))
    par_keys = jax.random.split(k_par, len(mods))

    inputs, params = {}, {}
    for i, mod in enumerate(mods):
        inputs[mod] = jax.random.normal(in_keys[i], (B, S, W, dims[mod]), jnp.float32)
        params[mod] = init_mod_params(par_keys[i], dims[mod], embed_dims[mod], k)

    outputs = multi_cnn_transformer_forward(inputs, params, mods, k=k)
    outputs = jax.block_until_ready(outputs)

    # correctness vs pure-JAX reference (same bf16 matmul operands, f32 accum)
    for mod in mods:
        ref = _ref_mod(inputs[mod], params[mod], k)
        assert outputs[mod].shape == (B, S, embed_dims[mod]), mod
        assert jnp.allclose(outputs[mod], ref, atol=2e-3, rtol=2e-3), mod

    print("KERNEL_OK")
</pallas_src>

<mosaic_0001>
module attributes {stable_mosaic.version = 11 : i64} {
  func.func @_cnn_highway_kernel(%arg0: i32, %arg1: i32, %arg2: memref<1x256x128xbf16, #tpu.memory_space<vmem>>, %arg3: memref<1x128x128xbf16, #tpu.memory_space<vmem>>, %arg4: memref<1x1x128xf32, #tpu.memory_space<vmem>>, %arg5: memref<1x128x256xbf16, #tpu.memory_space<vmem>>, %arg6: memref<1x1x256xf32, #tpu.memory_space<vmem>>, %arg7: memref<1x16x128xf32, #tpu.memory_space<vmem>>) attributes {dimension_semantics = [#tpu.dimension_semantics<parallel>, #tpu.dimension_semantics<parallel>], iteration_bounds = array<i64: 2, 1>, scalar_prefetch = 0 : i64, scratch_operands = 0 : i64, tpu.core_type = #tpu.core_type<tc>, window_params = [{transform_indices = @transform_0, window_bounds = array<i64: 1, 256, 128>}, {transform_indices = @transform_1, window_bounds = array<i64: 1, 128, 128>}, {transform_indices = @transform_2, window_bounds = array<i64: 1, 1, 128>}, {transform_indices = @transform_3, window_bounds = array<i64: 1, 128, 256>}, {transform_indices = @transform_4, window_bounds = array<i64: 1, 1, 256>}, {transform_indices = @transform_5, window_bounds = array<i64: 1, 16, 128>}]} {
    %c0 = arith.constant 0 : index
    %c0_0 = arith.constant 0 : index
    %c0_1 = arith.constant 0 : index
    %0 = vector.load %arg2[%c0, %c0_0, %c0_1] : memref<1x256x128xbf16, #tpu.memory_space<vmem>>, vector<1x256x128xbf16>
    %1 = vector.shape_cast %0 : vector<1x256x128xbf16> to vector<256x128xbf16>
    %c0_2 = arith.constant 0 : index
    %c0_3 = arith.constant 0 : index
    %c0_4 = arith.constant 0 : index
    %2 = vector.load %arg3[%c0_2, %c0_3, %c0_4] : memref<1x128x128xbf16, #tpu.memory_space<vmem>>, vector<1x128x128xbf16>
    %3 = vector.shape_cast %2 : vector<1x128x128xbf16> to vector<128x128xbf16>
    %cst = arith.constant dense<0.000000e+00> : vector<256x128xf32>
    %4 = tpu.matmul %1, %3, %cst {dimension_numbers = #tpu.dot_dimension_numbers<[1], [0], [0], [1], [0, 0, 1, 1], [], []>} : vector<256x128xbf16>, vector<128x128xbf16>, vector<256x128xf32> -> vector<256x128xf32>
    %5 = vector.shape_cast %4 : vector<256x128xf32> to vector<16x16x128xf32>
    %cst_5 = arith.constant dense<0xFF800000> : vector<16x128xf32>
    %6 = vector.multi_reduction <maximumf>, %5, %cst_5 [1] : vector<16x16x128xf32> to vector<16x128xf32>
    %c0_6 = arith.constant 0 : index
    %c0_7 = arith.constant 0 : index
    %c0_8 = arith.constant 0 : index
    %7 = vector.load %arg4[%c0_6, %c0_7, %c0_8] : memref<1x1x128xf32, #tpu.memory_space<vmem>>, vector<1x1x128xf32>
    %8 = vector.shape_cast %7 : vector<1x1x128xf32> to vector<1x128xf32>
    %9 = vector.broadcast %8 : vector<1x128xf32> to vector<16x128xf32>
    %10 = arith.addf %6, %9 : vector<16x128xf32>
    %11 = arith.truncf %10 : vector<16x128xf32> to vector<16x128xbf16>
    %c0_9 = arith.constant 0 : index
    %c0_10 = arith.constant 0 : index
    %c0_11 = arith.constant 0 : index
    %12 = vector.load %arg5[%c0_9, %c0_10, %c0_11] : memref<1x128x256xbf16, #tpu.memory_space<vmem>>, vector<1x128x256xbf16>
    %13 = vector.shape_cast %12 : vector<1x128x256xbf16> to vector<128x256xbf16>
    %cst_12 = arith.constant dense<0.000000e+00> : vector<16x256xf32>
    %14 = tpu.matmul %11, %13, %cst_12 {dimension_numbers = #tpu.dot_dimension_numbers<[1], [0], [0], [1], [0, 0, 1, 1], [], []>} : vector<16x128xbf16>, vector<128x256xbf16>, vector<16x256xf32> -> vector<16x256xf32>
    %c0_13 = arith.constant 0 : index
    %c0_14 = arith.constant 0 : index
    %c0_15 = arith.constant 0 : index
    %15 = vector.load %arg6[%c0_13, %c0_14, %c0_15] : memref<1x1x256xf32, #tpu.memory_space<vmem>>, vector<1x1x256xf32>
    %16 = vector.shape_cast %15 : vector<1x1x256xf32> to vector<1x256xf32>
    %17 = vector.broadcast %16 : vector<1x256xf32> to vector<16x256xf32>
    %18 = arith.addf %14, %17 : vector<16x256xf32>
    %19 = vector.extract_strided_slice %18 {offsets = [0, 0], sizes = [16, 128], strides = [1, 1]} : vector<16x256xf32> to vector<16x128xf32>
    %20 = vector.extract_strided_slice %18 {offsets = [0, 128], sizes = [16, 128], strides = [1, 1]} : vector<16x256xf32> to vector<16x128xf32>
    %21 = arith.negf %20 : vector<16x128xf32>
    %22 = math.exp %21 : vector<16x128xf32>
    %cst_16 = arith.constant 1.000000e+00 : f32
    %23 = vector.broadcast %cst_16 : f32 to vector<16x128xf32>
    %24 = arith.addf %23, %22 : vector<16x128xf32>
    %25 = arith.divf %23, %24 : vector<16x128xf32>
    %26 = arith.mulf %25, %19 : vector<16x128xf32>
    %cst_17 = arith.constant 1.000000e+00 : f32
    %27 = vector.broadcast %cst_17 : f32 to vector<16x128xf32>
    %28 = arith.subf %27, %25 : vector<16x128xf32>
    %29 = arith.mulf %28, %10 : vector<16x128xf32>
    %30 = arith.addf %26, %29 : vector<16x128xf32>
    %c0_18 = arith.constant 0 : index
    %c0_19 = arith.constant 0 : index
    %c0_20 = arith.constant 0 : index
    %31 = vector.load %arg7[%c0_18, %c0_19, %c0_20] : memref<1x16x128xf32, #tpu.memory_space<vmem>>, vector<1x16x128xf32>
    %32 = vector.shape_cast %31 : vector<1x16x128xf32> to vector<16x128xf32>
    %33 = vector.shape_cast %30 : vector<16x128xf32> to vector<1x16x128xf32>
    tpu.vector_store %arg7[%c0_18, %c0_19, %c0_20], %33 {strides = array<i32>} : memref<1x16x128xf32, #tpu.memory_space<vmem>>, vector<1x16x128xf32>,
    return
  }
  func.func @transform_0(%arg0: i32, %arg1: i32) -> (i32, i32, i32) {
    %c0_i32 = arith.constant 0 : i32
    %c0_i32_0 = arith.constant 0 : i32
    return %arg0, %arg1, %c0_i32 : i32, i32, i32
  }
  func.func @transform_1(%arg0: i32, %arg1: i32) -> (i32, i32, i32) {
    %c0_i32 = arith.constant 0 : i32
    %c0_i32_0 = arith.constant 0 : i32
    %c0_i32_1 = arith.constant 0 : i32
    return %arg0, %c0_i32, %c0_i32_0 : i32, i32, i32
  }
  func.func @transform_2(%arg0: i32, %arg1: i32) -> (i32, i32, i32) {
    %c0_i32 = arith.constant 0 : i32
    %c0_i32_0 = arith.constant 0 : i32
    %c0_i32_1 = arith.constant 0 : i32
    return %arg0, %c0_i32, %c0_i32_0 : i32, i32, i32
  }
  func.func @transform_3(%arg0: i32, %arg1: i32) -> (i32, i32, i32) {
    %c0_i32 = arith.constant 0 : i32
    %c0_i32_0 = arith.constant 0 : i32
    %c0_i32_1 = arith.constant 0 : i32
    return %arg0, %c0_i32, %c0_i32_0 : i32, i32, i32
  }
  func.func @transform_4(%arg0: i32, %arg1: i32) -> (i32, i32, i32) {
    %c0_i32 = arith.constant 0 : i32
    %c0_i32_0 = arith.constant 0 : i32
    %c0_i32_1 = arith.constant 0 : i32
    return %arg0, %c0_i32, %c0_i32_0 : i32, i32, i32
  }
  func.func @transform_5(%arg0: i32, %arg1: i32) -> (i32, i32, i32) {
    %c0_i32 = arith.constant 0 : i32
    %c0_i32_0 = arith.constant 0 : i32
    return %arg0, %arg1, %c0_i32 : i32, i32, i32
  }
}

</mosaic_0001>

<bundles_post_ra>
// kernel: tpu_custom_call.1
= control target key start
LH: loop header
LB: loop body
LE: loop exit
PB: predicated region body
PF: predicated region fallthrough
CT: control target
= control target key end

     0   :  { %s2182_s0 = inlined_call_operand.hbm [shape: bf16[2,256,128], index: 0, kind: input, shape index: {}]   ;;  %s2183_s1 = inlined_call_operand.hbm [shape: bf16[2,128,128], index: 1, kind: input, shape index: {}]   ;;  %s2184_s2 = inlined_call_operand.vmem [shape: f32[2,1,128], index: 2, kind: input, shape index: {}]   ;;  %s2185_s3 = inlined_call_operand.hbm [shape: bf16[2,128,256], index: 3, kind: input, shape index: {}]   ;;  %s2186_s4 = inlined_call_operand.vmem [shape: f32[2,1,256], index: 4, kind: input, shape index: {}]   ;;  %s2187_s5 = inlined_call_operand.hbm [shape: f32[2,16,128], index: 5, kind: output, shape index: {}]  }
   0x1   :  { %2198 = sst [smem:[#allocation17_spill]] %s2182_s0 }
   0x2   :  { %2199 = sst [smem:[#allocation18_spill]] %s2183_s1 }
   0x3   :  { %10 = vsyncpa [#allocation3], 0 }
   0x4   :  { %12 = vsyncpa [#allocation3 + $0x1], 0 }
   0x5   :  { %13 = vsyncpa [#allocation6], 0 }
   0x6   :  { %15 = vsyncpa [#allocation6 + $0x1], 0 }
   0x7   :  { %16 = vsyncpa [#allocation4], 0 }
   0x8   :  { %18 = vsyncpa [#allocation4 + $0x1], 0  ;;  %s1828_s18 = smov 0   ;;  %s1830_s19 = smov 0  }
   0x9   :  { %s1832_s20 = smov 0   ;;  %s1834_s21 = smov 0  }
   0xa   :  { %s1836_s22 = smov 0   ;;  %s1838_s23 = smov 0  }
   0xb LB: > { %2200 = sst [smem:[#allocation12_spill]] %s1773_s20  ;;  %s1859_s24 = sadd.s32 4294967295, %s1785_s23   ;;  %s1785_s23 = sphi %s1838_s23, %s24_s23   ;;  %s1781_s22 = sphi %s1836_s22, %s2226_s22   ;;  %s1777_s21 = sphi %s1834_s21, %s2225_s21   ;;  %s1773_s20 = sphi %s1832_s20, %s2224_s20   ;;  %s1769_s19 = sphi %s1830_s19, %s2228_s19   ;;  %s1765_s18 = sphi %s1828_s18, %s2227_s18  }
   0xc   : > { %2201 = sst [smem:[#allocation13_spill]] %s1781_s22  ;;  %s1332_s25 = sadd.s32 4294967294, %s1785_s23  }
   0xd   : > { %2202 = sst [smem:[#allocation14_spill]] %s1785_s23  ;;  %s36_s26 = sadd.s32 1, %s1781_s22 }
   0xe   : > { %s45_s27 = sadd.s32 1, %s1773_s20  ;;  %p38_p0 = scmp.ge.s32.totalorder %s36_s26, 2 }
   0xf   : > { %p52_p1 = scmp.ne.s32.totalorder %s1773_s20, %s1769_s19  ;;  %p53_p2 = scmp.eq.s32.totalorder %s1785_s23, 0 }
  0x10   : > { %p58_p3 = scmp.ne.s32.totalorder %s1769_s19, %s1765_s18  ;;  %s2230_s26 = smov (%p38_p0, %s36_s26), 0 }
  0x11   : > { %2203 = sst [smem:[#allocation15_spill]] %s2230_s26  ;;  %p1871_p4 = por %p53_p2, %p52_p1 }
  0x12   : > { %p59_p5 = scmp.eq.s32.totalorder %s1859_s24, 0  ;;  %s40_s29 = ssub.s32 %s1781_s22, %s2230_s26 }
  0x13   : > { %p188_p6 = scmp.eq.s32.totalorder %s1859_s24, 1  ;;  %p43_p7 = scmp.eq.s32.totalorder %s40_s29, 0 }
  0x14   : > { %p1879_p8 = por %p59_p5, %p58_p3  ;;  %p194_p10 = scmp.eq.s32.totalorder %s1332_s25, 1 }
  0x15   : > { %p1883_p9 = por %p188_p6, %p52_p1  ;;  %p1496_p13 = scmp.lt.s32.totalorder %s1785_s23, 2 }
  0x16   : > { %s2205_s30 = scalar_select %p1879_p8, 1, 0 }
  0x17   : > { %s2206_s6 = scalar_select %p1883_p9, 1, 0 }
  0x18   : > { %s1888_s7 = scalar_select %p43_p7, %s1773_s20, %s45_s27  }
  0x19   : > { %p1890_p11 = por %p194_p10, %p58_p3  ;;  %s1897_s9 = sand.u32 1, %s1773_s20  }
  0x1a   : > { %2207 = sst [smem:[#allocation16_spill]] %s1888_s7  ;;  %p1901_p0 = pnand %p1496_p13, %p1871_p4 }
  0x1b   : > { %s2208_s8 = scalar_select %p1890_p11, 1, 0 }
  0x1c   : > { %s237_s11 = sand.u32 1, %s1785_s23   ;;  %s1338_s12 = sshll.u32 %s1897_s9, 6 }
  0x1d   : > { %s1399_s13 = sshll.u32 %s1781_s22, 10  ;;  %s241_s14 = scalar_lea.vmem [#allocation5], %s1338_s12 }
  0x1e   : > { %s248_s15 = sshll.u32 %s241_s14, 4  ;;  %s2210_s1 = sld [smem:[#allocation18_spill]]  ;;  %s1913_s15 = int_to_ptr.vmem [resolvable:$true] %s248_s15 }
  0x1f   : > { %s1915_s27 = scalar_lea.sflag [#allocation6], %s237_s11  ;;  %p1921_p2 = pneg %p1901_p0 }
  0x24   : > { %s1911_s25 = scalar_lea.hbm %s2210_s1, %s1399_s13  ;;  %s1614_s14 = scalar_lea.hbm %s2210_s1, 2048 }
  0x25   : > { %s1609_s28 = scalar_lea.hbm %s1911_s25, 1024  ;;  %p1615_p5 = scmp.lt.u32.totalorder %s1911_s25, %s2210_s1 }
  0x26   : > { %p1610_p1 = scmp.ne.s32.totalorder %s1911_s25, %s1609_s28  ;;  %p1616_p6 = scmp.lt.u32.totalorder %s1614_s14, %s1609_s28 }
  0x27   : > { %p1618_p10 = scmp.lt.u32.totalorder %s1609_s28, %s1911_s25 }
  0x28   : > { %p1612_p3 = pnand %p1921_p2, %p1610_p1  ;;  %p1617_p7 = por %p1616_p6, %p1615_p5 }
  0x2a   : > { %p1613_p4 = pneg %p1612_p3  ;;  %p1619_p13 = por %p1618_p10, %p1617_p7 }
  0x2c   : > { %p1620_p12 = pnand %p1619_p13, %p1613_p4 }
  0x2e   : > { %1623 = shalt.err (!%p1620_p12)
}
  0x2f   : > { %s1624_s11 = scalar_lea.vmem %s1913_s15, 1024  ;;  %s1787_s12 = smov [#allocation5]  }
  0x30   : > { %p1625_p1 = scmp.ne.s32.totalorder %s1913_s15, %s1624_s11  ;;  %s1629_s13 = sshll.u32 %s1787_s12, 4  ;;  %s1630_s13 = int_to_ptr.vmem [resolvable:$false] %s1629_s13 }
  0x31   : > { %s1631_s16 = scalar_lea.vmem %s1630_s13, 2048  ;;  %p1632_p9 = scmp.lt.s32.totalorder %s1913_s15, %s1630_s13 }
  0x32   : > { %p1627_p3 = pnand %p1625_p1, %p1921_p2  ;;  %p1633_p8 = scmp.lt.s32.totalorder %s1631_s16, %s1624_s11 }
  0x34   : > { %p1628_p11 = pneg %p1627_p3  ;;  %p1634_p5 = por %p1633_p8, %p1632_p9 }
  0x36   : > { %p1635_p6 = pnand %p1634_p5, %p1628_p11 }
  0x38   : > { %1638 = shalt.err (!%p1635_p6)
}
  0x39   : > { %s2191_s28 = smov 64   ;;  %s2192_s14 = smov 4  }
  0x3a   : > { %1488 = dma.hbm_to_vmem [thread:$0]  (!%p1901_p0), %s1911_s25, 1024, %s1913_s15, %s1915_s27, %s2191_s28, %s2191_s28, %s2192_s14  }
  0x3b   : > { %p1344_p8 = scmp.ge.s32.totalorder %s1785_s23, 1  ;;  %p290_p9 = scmp.lt.s32.totalorder %s1785_s23, 3 }
  0x3c   : > { %s2197_s11 = sshll.u32 %s1897_s9, 7  ;;  %s1398_s12 = sshll.u32 %s1781_s22, 11 }
  0x3d   : > { %p1950_p11 = pnand %p1344_p8, %p290_p9  ;;  %s2213_s0 = sld [smem:[#allocation17_spill]] }
  0x3e   : > { %s218_s26 = scalar_lea.vmem [#allocation2], %s2197_s11  ;;  %s1968_s14 = scalar_lea.hbm %s2185_s3, %s1398_s12 }
  0x3f   : > { %s2212_s17 = scalar_select %p1950_p11, 1, 0 }
  0x40   : > { %s227_s15 = sshll.u32 %s218_s26, 4  ;;  %s215_s22 = scalar_lea.sflag [#allocation3], %s1897_s9  ;;  %s1963_s15 = int_to_ptr.vmem [resolvable:$true] %s227_s15 }
  0x43   : > { %s1959_s1 = scalar_lea.hbm %s2213_s0, %s1398_s12  ;;  %s1644_s20 = scalar_lea.hbm %s2213_s0, 4096 }
  0x44   : > { %s1639_s7 = scalar_lea.hbm %s1959_s1, 2048  ;;  %p1645_p10 = scmp.lt.u32.totalorder %s1959_s1, %s2213_s0 }
  0x45   : > { %p1640_p12 = scmp.ne.s32.totalorder %s1959_s1, %s1639_s7  ;;  %p1646_p13 = scmp.lt.u32.totalorder %s1644_s20, %s1639_s7 }
  0x46   : > { %p1648_p3 = scmp.lt.u32.totalorder %s1639_s7, %s1959_s1 }
  0x47   : > { %p1642_p4 = pnand %p1640_p12, %p1921_p2  ;;  %p1647_p1 = por %p1646_p13, %p1645_p10 }
  0x49   : > { %p1643_p7 = pneg %p1642_p4  ;;  %p1649_p5 = por %p1648_p3, %p1647_p1 }
  0x4b   : > { %p1650_p6 = pnand %p1649_p5, %p1643_p7 }
  0x4d   : > { %1653 = shalt.err (!%p1650_p6)
}
  0x4e   : > { %s1654_s26 = scalar_lea.vmem %s1963_s15, 2048  ;;  %s1790_s28 = smov [#allocation2]  }
  0x4f   : > { %p1655_p8 = scmp.ne.s32.totalorder %s1963_s15, %s1654_s26  ;;  %s1659_s12 = sshll.u32 %s1790_s28, 4  ;;  %s1660_s12 = int_to_ptr.vmem [resolvable:$false] %s1659_s12 }
  0x50   : > { %s1661_s23 = scalar_lea.vmem %s1660_s12, 4096  ;;  %p1662_p4 = scmp.lt.s32.totalorder %s1963_s15, %s1660_s12 }
  0x51   : > { %p1657_p9 = pnand %p1655_p8, %p1921_p2  ;;  %p1663_p11 = scmp.lt.s32.totalorder %s1661_s23, %s1654_s26 }
  0x53   : > { %p1658_p12 = pneg %p1657_p9  ;;  %p1664_p10 = por %p1663_p11, %p1662_p4 }
  0x55   : > { %p1665_p13 = pnand %p1664_p10, %p1658_p12 }
  0x57   : > { %1668 = shalt.err (!%p1665_p13)
}
  0x58   : > { %s2214_s20 = smov 4   ;;  %s2215_s7 = smov 64  }
  0x59   : > { %1485 = dma.hbm_to_vmem [thread:$0]  (!%p1901_p0), %s1959_s1, 2048, %s1963_s15, %s215_s22, %s2215_s7, %s2215_s7, %s2214_s20  }
  0x5a   : > { %s2216_s11 = sshll.u32 %s1897_s9, 7  ;;  %s1669_s16 = scalar_lea.hbm %s1968_s14, 2048 }
  0x5b   : > { %s268_s25 = scalar_lea.vmem [#allocation7], %s2216_s11  ;;  %p1670_p11 = scmp.ne.s32.totalorder %s1968_s14, %s1669_s16 }
  0x5c   : > { %s275_s13 = sshll.u32 %s268_s25, 4  ;;  %s1674_s12 = scalar_lea.hbm %s2185_s3, 4096  ;;  %s1999_s13 = int_to_ptr.vmem [resolvable:$true] %s275_s13 }
  0x5d   : > { %p1672_p7 = pnand %p1670_p11, %p1921_p2  ;;  %p1675_p3 = scmp.lt.u32.totalorder %s1968_s14, %s2185_s3 }
  0x5e   : > { %p1676_p5 = scmp.lt.u32.totalorder %s1674_s12, %s1669_s16  ;;  %p1678_p8 = scmp.lt.u32.totalorder %s1669_s16, %s1968_s14 }
  0x5f   : > { %p1673_p1 = pneg %p1672_p7 }
  0x60   : > { %p1677_p6 = por %p1676_p5, %p1675_p3 }
  0x62   : > { %p1679_p9 = por %p1678_p8, %p1677_p6 }
  0x64   : > { %p1680_p12 = pnand %p1679_p9, %p1673_p1 }
  0x66   : > { %1683 = shalt.err (!%p1680_p12)
}
  0x67   : > { %s1684_s1 = scalar_lea.vmem %s1999_s13, 2048  ;;  %s1791_s22 = smov [#allocation7]  }
  0x68   : > { %p1685_p4 = scmp.ne.s32.totalorder %s1999_s13, %s1684_s1  ;;  %s1689_s9 = sshll.u32 %s1791_s22, 4  ;;  %s1690_s9 = int_to_ptr.vmem [resolvable:$false] %s1689_s9 }
  0x69   : > { %s1691_s0 = scalar_lea.vmem %s1690_s9, 4096  ;;  %p1692_p11 = scmp.lt.s32.totalorder %s1999_s13, %s1690_s9 }
  0x6a   : > { %p1687_p10 = pnand %p1685_p4, %p1921_p2  ;;  %p1693_p7 = scmp.lt.s32.totalorder %s1691_s0, %s1684_s1 }
  0x6c   : > { %p1688_p13 = pneg %p1687_p10  ;;  %p1694_p3 = por %p1693_p7, %p1692_p11 }
  0x6e   : > { %p1695_p5 = pnand %p1694_p3, %p1688_p13 }
  0x70   : > { %1698 = shalt.err (!%p1695_p5)
}
  0x71   : > { %s1792_s15 = smov 128   ;;  %s1793_s20 = smov 8  }
  0x72   : > { %1491 = dma.hbm_to_vmem [thread:$0]  (!%p1901_p0), %s1968_s14, 2048, %s1999_s13, %s1915_s27, %s1792_s15, %s1792_s15, %s1793_s20  }
  0x73   : > { %p2217_p2 = scmp.ne.s32.totalorder %s2212_s17, 0 }
  0x74   : > { %s2026_s29 = sand.u32 (!%p2217_p2), 1, %s1769_s19   ;;  %p2218_p1 = scmp.ne.s32.totalorder (!%p2217_p2), %s2205_s30, 0 }
  0x75   : > { %294 = sbr.rel (%p2217_p2) target bundleno = 722 (0x2d2), region = 40  ;;  %s1345_s7 = sshll.u32 (!%p2217_p2), %s2026_s29, 7 }
  0x76   : > { %s297_s11 = scalar_lea.sflag (!%p2217_p2), [#allocation3], %s2026_s29  ;;  %s2032_s25 = scalar_lea.vmem (!%p2217_p2), [#allocation2], %s1345_s7 }
  0x7c   : > { %1752 = dma.done.wait (%p2218_p1), %s297_s11, 2048  }
  0x7d   : > { %1754 = vsyncadd (%p2218_p1), %s297_s11, 4294965248  ;;  %s305_s10 = sand.u32 1, %s1859_s24   ;;  %s1346_s27 = sshll.u32 %s2026_s29, 6 }
  0x7e   : > { %s306_s14 = scalar_lea.sflag [#allocation6], %s305_s10  ;;  %s309_s17 = scalar_lea.vmem [#allocation5], %s1346_s27 }
  0x7f   : > { %1756 = dma.done.wait (%p2218_p1), %s306_s14, 3072  }
  0x80   : > { %1758 = vsyncadd (%p2218_p1), %s306_s14, 4294964224  ;;  %v1553_v0 = vld [vmem:[%s309_s17] sm:$0xff]   ;;  %v1554_v1 = vld [vmem:[%s309_s17 + $0x8] sm:$0xff]   ;;  %s318_s24 = scalar_lea.vmem [#allocation7], %s1345_s7  ;;  %v1794_v40 = vmov 0   ;;  %p363_p0 = scmp.lt.s32.totalorder %s1777_s21, 1 }
  0x81   : > { %1426 = vmatprep.subr.bf16.mxu0 %v1553_v0  ;;  %v1555_v2 = vld [vmem:[%s309_s17 + $0x10] sm:$0xff]   ;;  %v1556_v3 = vld [vmem:[%s309_s17 + $0x18] sm:$0xff]   ;;  %v1561_v4 = vld [vmem:[%s2032_s25] sm:$0xff]   ;;  %1085 = vmatprep.mubr.bf16.mxu1 %v1794_v40  ;;  %vm937_vm0 = vcmask 1041409   ;;  %vm940_vm1 = vcmask 1042434   ;;  %vm943_vm2 = vcmask 1043459  }
  0x82   : > { %1427 = vmatpush3.bf16.msra.mxu0 %v1553_v0  ;;  %1442 = vmatprep.mubr.bf16.mxu0 %v1561_v4  ;;  %v1557_v5 = vld [vmem:[%s309_s17 + $0x20] sm:$0xff]   ;;  %v1558_v6 = vld [vmem:[%s309_s17 + $0x28] sm:$0xff]   ;;  %v1559_v7 = vld [vmem:[%s309_s17 + $0x30] sm:$0xff]   ;;  %s2064_s30 = scalar_select %p363_p0, %s1777_s21, 1  ;;  %vm946_vm3 = vcmask 1044484   ;;  %vm949_vm4 = vcmask 1045509  }
  0x83   : > { %1428 = vmatprep.subr.bf16.mxu0 %v1554_v1  ;;  %v1560_v8 = vld [vmem:[%s309_s17 + $0x38] sm:$0xff]   ;;  %v1562_v9 = vld [vmem:[%s2032_s25 + $0x8] sm:$0xff]   ;;  %v1563_v10 = vld [vmem:[%s2032_s25 + $0x10] sm:$0xff]   ;;  %vm952_vm5 = vcmask 1046534   ;;  %vm955_vm6 = vcmask 1047559   ;;  %s1348_s22 = sshll.u32 %s2026_s29, 4 }
  0x84   : > { %v1564_v11 = vld [vmem:[%s2032_s25 + $0x18] sm:$0xff]   ;;  %v1565_v12 = vld [vmem:[%s2032_s25 + $0x20] sm:$0xff]   ;;  %v1566_v13 = vld [vmem:[%s2032_s25 + $0x28] sm:$0xff]   ;;  %s365_s26 = scalar_lea.vmem %s2184_s2, %s2064_s30  ;;  %s1349_s28 = sshll.u32 %s2064_s30, 1 }
  0x85   : > { %v1567_v14 = vld [vmem:[%s2032_s25 + $0x30] sm:$0xff]   ;;  %v1568_v15 = vld [vmem:[%s2032_s25 + $0x38] sm:$0xff]   ;;  %v1569_v16 = vld [vmem:[%s2032_s25 + $0x40] sm:$0xff]   ;;  %s369_s1 = scalar_lea.vmem %s2186_s4, %s1349_s28  ;;  %s1401_s9 = sshll.u32 %s1777_s21, 8 }
  0x86   : > { %1429 = vmatpush3.bf16.msra.mxu0 %v1554_v1  ;;  %v1570_v17 = vld [vmem:[%s2032_s25 + $0x48] sm:$0xff]   ;;  %v1571_v18 = vld [vmem:[%s2032_s25 + $0x50] sm:$0xff]   ;;  %v1572_v19 = vld [vmem:[%s2032_s25 + $0x58] sm:$0xff]   ;;  %s361_s0 = scalar_lea.vmem [#allocation8], %s1348_s22  ;;  %s2131_s11 = scalar_lea.hbm %s2187_s5, %s1401_s9 }
  0x87   : > { %1430 = vmatprep.subr.bf16.mxu0 %v1555_v2  ;;  %v1573_v20 = vld [vmem:[%s2032_s25 + $0x60] sm:$0xff]   ;;  %v1574_v21 = vld [vmem:[%s2032_s25 + $0x68] sm:$0xff]   ;;  %v1575_v22 = vld [vmem:[%s2032_s25 + $0x70] sm:$0xff]   ;;  %s1180_s15 = sshll.u32 %s361_s0, 4  ;;  %p2219_p8 = scmp.ne.s32.totalorder %s2206_s6, 0  ;;  %s2133_s15 = int_to_ptr.vmem [resolvable:$true] %s1180_s15 }
  0x88   : > { %v1576_v23 = vld [vmem:[%s2032_s25 + $0x78] sm:$0xff]   ;;  %v1577_v24 = vld [vmem:[%s318_s24 + $0x4] ss:$8 sps:$4 sm:$0xff]   ;;  %v1579_v25 = vld [vmem:[%s318_s24] ss:$8 sps:$4 sm:$0xff]   ;;  %s1165_s25 = scalar_lea.sflag [#allocation4], %s2026_s29 }
  0x89   : > { %1053 = vmatprep.subr.bf16.mxu1 %v1577_v24  ;;  %v1580_v26 = vld [vmem:[%s318_s24 + $0x14] ss:$8 sps:$4 sm:$0xff]   ;;  %v1582_v27 = vld [vmem:[%s318_s24 + $0x10] ss:$8 sps:$4 sm:$0xff]   ;;  %v1583_v28 = vld [vmem:[%s318_s24 + $0x24] ss:$8 sps:$4 sm:$0xff]  }
  0x8a   : > { %1431 = vmatpush3.bf16.msra.mxu0 %v1555_v2  ;;  %1054 = vmatpush1.bf16.msra.mxu1 %v1579_v25  ;;  %v1585_v29 = vld [vmem:[%s318_s24 + $0x20] ss:$8 sps:$4 sm:$0xff]   ;;  %v1586_v30 = vld [vmem:[%s318_s24 + $0x34] ss:$8 sps:$4 sm:$0xff]   ;;  %v1588_v31 = vld [vmem:[%s318_s24 + $0x30] ss:$8 sps:$4 sm:$0xff]  }
  0x8b   : > { %1432 = vmatprep.subr.bf16.mxu0 %v1556_v3  ;;  %1055 = vmatprep.subr.bf16.mxu1 %v1580_v26  ;;  %v1589_v32 = vld [vmem:[%s318_s24 + $0x44] ss:$8 sps:$4 sm:$0xff]   ;;  %v1591_v33 = vld [vmem:[%s318_s24 + $0x40] ss:$8 sps:$4 sm:$0xff]   ;;  %v1592_v34 = vld [vmem:[%s318_s24 + $0x54] ss:$8 sps:$4 sm:$0xff]  }
  0x8c   : > { %v1594_v35 = vld [vmem:[%s318_s24 + $0x50] ss:$8 sps:$4 sm:$0xff]   ;;  %v1595_v36 = vld [vmem:[%s318_s24 + $0x64] ss:$8 sps:$4 sm:$0xff]   ;;  %v1597_v37 = vld [vmem:[%s318_s24 + $0x60] ss:$8 sps:$4 sm:$0xff]  }
  0x8d   : > { %v1598_v38 = vld [vmem:[%s318_s24 + $0x74] ss:$8 sps:$4 sm:$0xff]   ;;  %v1600_v39 = vld [vmem:[%s318_s24 + $0x70] ss:$8 sps:$4 sm:$0xff]   ;;  %v2070_v63 = vld [vmem:[%s365_s26] ss:$0 sm:$0xff] }
  0x8e   : > { %1433 = vmatpush3.bf16.msra.mxu0 %v1556_v3  ;;  %1056 = vmatpush1.bf16.msra.mxu1 %v1582_v27  ;;  %s1699_s10 = scalar_lea.vmem %s2133_s15, 256  ;;  %s1795_s21 = smov [#allocation8]  }
  0x8f   : > { %1434 = vmatprep.subr.bf16.mxu0 %v1557_v5  ;;  %1057 = vmatprep.subr.bf16.mxu1 %v1583_v28  ;;  %p1700_p6 = scmp.ne.s32.totalorder %s2133_s15, %s1699_s10  ;;  %s1703_s27 = sshll.u32 %s1795_s21, 4  ;;  %s1704_s27 = int_to_ptr.vmem [resolvable:$false] %s1703_s27 }
  0x90   : > { %s1705_s14 = scalar_lea.vmem %s1704_s27, 512  ;;  %p1706_p4 = scmp.lt.s32.totalorder %s2133_s15, %s1704_s27 }
  0x91   : > { %p1701_p9 = pnand %p1700_p6, %p2219_p8  ;;  %p1707_p10 = scmp.lt.s32.totalorder %s1705_s14, %s1699_s10 }
  0x92   : > { %1435 = vmatpush3.bf16.msra.mxu0 %v1557_v5  ;;  %1058 = vmatpush1.bf16.msra.mxu1 %v1585_v29 }
  0x93   : > { %1436 = vmatprep.subr.bf16.mxu0 %v1558_v6  ;;  %1059 = vmatprep.subr.bf16.mxu1 %v1586_v30  ;;  %p1702_p12 = pneg %p1701_p9  ;;  %p1708_p13 = por %p1707_p10, %p1706_p4 }
  0x95   : > { %p1709_p11 = pnand %p1708_p13, %p1702_p12 }
  0x96   : > { %1437 = vmatpush3.bf16.msra.mxu0 %v1558_v6  ;;  %1060 = vmatpush1.bf16.msra.mxu1 %v1588_v31 }
  0x97   : > { %1438 = vmatprep.subr.bf16.mxu0 %v1559_v7  ;;  %1061 = vmatprep.subr.bf16.mxu1 %v1589_v32 }
  0x9a   : > { %1439 = vmatpush3.bf16.msra.mxu0 %v1559_v7  ;;  %1062 = vmatpush1.bf16.msra.mxu1 %v1591_v33 }
  0x9b   : > { %1440 = vmatprep.subr.bf16.mxu0 %v1560_v8  ;;  %1063 = vmatprep.subr.bf16.mxu1 %v1592_v34 }
  0x9e   : > { %1441 = vmatpush3.bf16.msra.mxu0 %v1560_v8  ;;  %1064 = vmatpush1.bf16.msra.mxu1 %v1594_v35 }
  0x9f   : > { %1065 = vmatprep.subr.bf16.mxu1 %v1595_v36 }
  0xa1   : > { %1443 = vmatmul.mubr.bf16.vlgmr.msra.gmra.mrb[0].mxu0 %v1562_v9 }
  0xa2   : > { %1446 = vmatprep.mubr.bf16.mxu0 %v1563_v10  ;;  %1066 = vmatpush1.bf16.msra.mxu1 %v1597_v37 }
  0xa3   : > { %1067 = vmatprep.subr.bf16.mxu1 %v1598_v38 }
  0xa6   : > { %1068 = vmatpush1.bf16.msra.mxu1 %v1600_v39 }
  0xa9   : > { %1447 = vmatmul.mubr.bf16.gmra.mrb[4].mxu0 %v1564_v11 }
  0xaa   : > { %1450 = vmatprep.mubr.bf16.mxu0 %v1565_v12 }
  0xb1   : > { %1451 = vmatmul.mubr.bf16.gmra.mrb[8].mxu0 %v1566_v13 }
  0xb2   : > { %1454 = vmatprep.mubr.bf16.mxu0 %v1567_v14 }
  0xb9   : > { %1455 = vmatmul.mubr.bf16.gmra.mrb[12].mxu0 %v1568_v15 }
  0xba   : > { %1458 = vmatprep.mubr.bf16.mxu0 %v1569_v16 }
  0xc1   : > { %1459 = vmatmul.mubr.bf16.gmra.mrb[16].mxu0 %v1570_v17 }
  0xc2   : > { %1462 = vmatprep.mubr.bf16.mxu0 %v1571_v18 }
  0xc9   : > { %1463 = vmatmul.mubr.bf16.gmra.mrb[20].mxu0 %v1572_v19 }
  0xca   : > { %1466 = vmatprep.mubr.bf16.mxu0 %v1573_v20 }
  0xd1   : > { %1467 = vmatmul.mubr.bf16.gmra.mrb[24].mxu0 %v1574_v21 }
  0xd2   : > { %1470 = vmatprep.mubr.bf16.mxu0 %v1575_v22 }
  0xd9   : > { %1471 = vmatmul.mubr.bf16.gmra.mrb[28].mxu0 %v1576_v23 }
 0x174   : > { %v1444_v41 = vpop.f32.mrb[0].mxu0 }
 0x175   : > { %v598_v42 = vpop.f32.mrb[1].mxu0 }
 0x176   : > { %v1445_v43 = vpop.f32.mrb[2].mxu0 }
 0x177   : > { %v732_v44 = vmax.f32 %v1444_v41, %v1445_v43  ;;  %v601_v45 = vpop.f32.mrb[3].mxu0 }
 0x178   : > { %v725_v46 = vmax.f32 %v598_v42, %v601_v45 }
 0x179   : > { %v733_v47 = vrot.slane %v732_v44, 4 }
 0x17a   : > { %v726_v48 = vrot.slane %v725_v46, 4 }
 0x17b   : > { %v734_v49 = vmax.f32 %v732_v44, %v733_v47 }
 0x17c   : > { %v727_v50 = vmax.f32 %v725_v46, %v726_v48  ;;  %v1448_v51 = vpop.f32.mrb[4].mxu0 }
 0x17d   : > { %v735_v52 = vrot.slane %v734_v49, 2  ;;  %v614_v53 = vpop.f32.mrb[5].mxu0 }
 0x17e   : > { %v728_v54 = vrot.slane %v727_v50, 2  ;;  %v1449_v55 = vpop.f32.mrb[6].mxu0 }
 0x17f   : > { %v736_v56 = vmax.f32 %v734_v49, %v735_v52  ;;  %v746_v57 = vmax.f32 %v1448_v51, %v1449_v55  ;;  %v617_v58 = vpop.f32.mrb[7].mxu0 }
 0x180   : > { %v729_v59 = vmax.f32 %v727_v50, %v728_v54  ;;  %v739_v60 = vmax.f32 %v614_v53, %v617_v58 }
 0x181   : > { %v737_v61 = vrot.slane %v736_v56, 1  ;;  %v747_v62 = vrot.slane %v746_v57, 4 }
 0x182   : > { %v730_v0 = vrot.slane %v729_v59, 1  ;;  %v740_v1 = vrot.slane %v739_v60, 4 }
 0x183   : > { %v738_v2 = vmax.f32 %v736_v56, %v737_v61  ;;  %v748_v3 = vmax.f32 %v746_v57, %v747_v62 }
 0x184   : > { %v731_v4 = vmax.f32 %v729_v59, %v730_v0  ;;  %v741_v5 = vmax.f32 %v739_v60, %v740_v1  ;;  %v1452_v6 = vpop.f32.mrb[8].mxu0 }
 0x185   : > { %v845_v7 = vadd.f32 %v2070_v63, %v738_v2  ;;  %v749_v8 = vrot.slane %v748_v3, 2  ;;  %v630_v9 = vpop.f32.mrb[9].mxu0 }
 0x186   : > { %v844_v10 = vadd.f32 %v2070_v63, %v731_v4  ;;  %v742_v11 = vrot.slane %v741_v5, 2  ;;  %v1453_v12 = vpop.f32.mrb[10].mxu0 }
 0x187   : > { %v861_v13 = vpack.c.bf16 %v845_v7, %v845_v7  ;;  %v1128_v14 = vrot.slane %v845_v7, 7  ;;  %v750_v15 = vmax.f32 %v748_v3, %v749_v8  ;;  %v760_v16 = vmax.f32 %v1452_v6, %v1453_v12  ;;  %v633_v17 = vpop.f32.mrb[11].mxu0 }
 0x188   : > { %v860_v18 = vpack.c.bf16 %v844_v10, %v844_v10  ;;  %v743_v19 = vmax.f32 %v741_v5, %v742_v11  ;;  %v753_v20 = vmax.f32 %v630_v9, %v633_v17 }
 0x189   : > { %v921_v21 = vunpack.c.l.b16 %v861_v13  ;;  %v1129_v22 = vsel %vm937_vm0, %v1128_v14, %v844_v10  ;;  %v751_v23 = vrot.slane %v750_v15, 1  ;;  %v761_v24 = vrot.slane %v760_v16, 4 }
 0x18a   : > { %v920_v25 = vunpack.c.l.b16 %v860_v18  ;;  %v744_v26 = vrot.slane %v743_v19, 1  ;;  %v754_v27 = vrot.slane %v753_v20, 4 }
 0x18b   : > { %v936_v28 = vrot.slane %v921_v21, 7  ;;  %v752_v29 = vmax.f32 %v750_v15, %v751_v23  ;;  %v762_v30 = vmax.f32 %v760_v16, %v761_v24 }
 0x18c   : > { %v745_v31 = vmax.f32 %v743_v19, %v744_v26  ;;  %v755_v32 = vmax.f32 %v753_v20, %v754_v27  ;;  %v1456_v33 = vpop.f32.mrb[12].mxu0 }
 0x18d   : > { %v938_v34 = vsel %vm937_vm0, %v936_v28, %v920_v25  ;;  %v847_v35 = vadd.f32 %v2070_v63, %v752_v29  ;;  %v763_v36 = vrot.slane %v762_v30, 2  ;;  %v646_v37 = vpop.f32.mrb[13].mxu0 }
 0x18e   : > { %v846_v38 = vadd.f32 %v2070_v63, %v745_v31  ;;  %v756_v39 = vrot.slane %v755_v32, 2  ;;  %v1457_v40 = vpop.f32.mrb[14].mxu0 }
 0x18f   : > { %v863_v41 = vpack.c.bf16 %v847_v35, %v847_v35  ;;  %v764_v42 = vmax.f32 %v762_v30, %v763_v36  ;;  %v774_v43 = vmax.f32 %v1456_v33, %v1457_v40  ;;  %v649_v44 = vpop.f32.mrb[15].mxu0  ;;  %v1132_v50 = vrot.slane %v847_v35, 5 }
 0x190   : > { %v862_v45 = vpack.c.bf16 %v846_v38, %v846_v38  ;;  %v1130_v46 = vrot.slane %v846_v38, 6  ;;  %v757_v47 = vmax.f32 %v755_v32, %v756_v39  ;;  %v767_v48 = vmax.f32 %v646_v37, %v649_v44 }
 0x191   : > { %v923_v49 = vunpack.c.l.b16 %v863_v41  ;;  %v765_v51 = vrot.slane %v764_v42, 1  ;;  %v775_v52 = vrot.slane %v774_v43, 4 }
 0x192   : > { %v922_v53 = vunpack.c.l.b16 %v862_v45  ;;  %v1131_v54 = vsel %vm940_vm1, %v1130_v46, %v1129_v22  ;;  %v758_v55 = vrot.slane %v757_v47, 1  ;;  %v768_v56 = vrot.slane %v767_v48, 4 }
 0x193   : > { %v766_v57 = vmax.f32 %v764_v42, %v765_v51  ;;  %v1133_v58 = vsel %vm943_vm2, %v1132_v50, %v1131_v54  ;;  %v776_v59 = vmax.f32 %v774_v43, %v775_v52  ;;  %v942_v4 = vrot.slane %v923_v49, 5 }
 0x194   : > { %v939_v60 = vrot.slane %v922_v53, 6  ;;  %v759_v61 = vmax.f32 %v757_v47, %v758_v55  ;;  %v769_v62 = vmax.f32 %v767_v48, %v768_v56  ;;  %v1460_v0 = vpop.f32.mrb[16].mxu0 }
 0x195   : > { %v849_v1 = vadd.f32 %v2070_v63, %v766_v57  ;;  %v777_v2 = vrot.slane %v776_v59, 2  ;;  %v662_v3 = vpop.f32.mrb[17].mxu0 }
 0x196   : > { %v941_v5 = vsel %vm940_vm1, %v939_v60, %v938_v34  ;;  %v848_v6 = vadd.f32 %v2070_v63, %v759_v61  ;;  %v770_v7 = vrot.slane %v769_v62, 2  ;;  %v1461_v8 = vpop.f32.mrb[18].mxu0 }
 0x197   : > { %v865_v9 = vpack.c.bf16 %v849_v1, %v849_v1  ;;  %v1136_v10 = vrot.slane %v849_v1, 3  ;;  %v778_v11 = vmax.f32 %v776_v59, %v777_v2  ;;  %v788_v12 = vmax.f32 %v1460_v0, %v1461_v8  ;;  %v665_v13 = vpop.f32.mrb[19].mxu0 }
 0x198   : > { %v864_v14 = vpack.c.bf16 %v848_v6, %v848_v6  ;;  %v1134_v15 = vrot.slane %v848_v6, 4  ;;  %v771_v16 = vmax.f32 %v769_v62, %v770_v7  ;;  %v781_v17 = vmax.f32 %v662_v3, %v665_v13 }
 0x199   : > { %v925_v18 = vunpack.c.l.b16 %v865_v9  ;;  %v779_v19 = vrot.slane %v778_v11, 1  ;;  %v789_v20 = vrot.slane %v788_v12, 4  ;;  %v944_v21 = vsel %vm943_vm2, %v942_v4, %v941_v5 }
 0x19a   : > { %v924_v22 = vunpack.c.l.b16 %v864_v14  ;;  %v1135_v23 = vsel %vm946_vm3, %v1134_v15, %v1133_v58  ;;  %v772_v24 = vrot.slane %v771_v16, 1  ;;  %v782_v25 = vrot.slane %v781_v17, 4 }
 0x19b   : > { %v780_v26 = vmax.f32 %v778_v11, %v779_v19  ;;  %v790_v27 = vmax.f32 %v788_v12, %v789_v20  ;;  %v1137_v28 = vsel %vm949_vm4, %v1136_v10, %v1135_v23  ;;  %v948_v36 = vrot.slane %v925_v18, 3 }
 0x19c   : > { %v945_v29 = vrot.slane %v924_v22, 4  ;;  %v773_v30 = vmax.f32 %v771_v16, %v772_v24  ;;  %v783_v31 = vmax.f32 %v781_v17, %v782_v25  ;;  %v1464_v32 = vpop.f32.mrb[20].mxu0 }
 0x19d   : > { %v851_v33 = vadd.f32 %v2070_v63, %v780_v26  ;;  %v791_v34 = vrot.slane %v790_v27, 2  ;;  %v678_v35 = vpop.f32.mrb[21].mxu0 }
 0x19e   : > { %v850_v37 = vadd.f32 %v2070_v63, %v773_v30  ;;  %v784_v38 = vrot.slane %v783_v31, 2  ;;  %v1465_v39 = vpop.f32.mrb[22].mxu0  ;;  %v947_v40 = vsel %vm946_vm3, %v945_v29, %v944_v21 }
 0x19f   : > { %v1140_v41 = vrot.slane %v851_v33, 1  ;;  %v792_v42 = vmax.f32 %v790_v27, %v791_v34  ;;  %v802_v43 = vmax.f32 %v1464_v32, %v1465_v39  ;;  %v681_v44 = vpop.f32.mrb[23].mxu0  ;;  %v867_v45 = vpack.c.bf16 %v851_v33, %v851_v33 }
 0x1a0   : > { %v866_v46 = vpack.c.bf16 %v850_v37, %v850_v37  ;;  %v1138_v47 = vrot.slane %v850_v37, 2  ;;  %v785_v48 = vmax.f32 %v783_v31, %v784_v38  ;;  %v795_v49 = vmax.f32 %v678_v35, %v681_v44 }
 0x1a1   : > { %v793_v50 = vrot.slane %v792_v42, 1  ;;  %v803_v51 = vrot.slane %v802_v43, 4  ;;  %v927_v52 = vunpack.c.l.b16 %v867_v45  ;;  %v950_v53 = vsel %vm949_vm4, %v948_v36, %v947_v40 }
 0x1a2   : > { %v926_v54 = vunpack.c.l.b16 %v866_v46  ;;  %v786_v55 = vrot.slane %v785_v48, 1  ;;  %v796_v56 = vrot.slane %v795_v49, 4  ;;  %v1139_v57 = vsel %vm952_vm5, %v1138_v47, %v1137_v28 }
 0x1a3   : > { %v794_v58 = vmax.f32 %v792_v42, %v793_v50  ;;  %v804_v59 = vmax.f32 %v802_v43, %v803_v51  ;;  %v2092_v60 = vsel %vm955_vm6, %v1140_v41, %v1139_v57  ;;  %v954_v9 = vrot.slane %v927_v52, 1 }
 0x1a4   : > { %v951_v61 = vrot.slane %v926_v54, 2  ;;  %v787_v62 = vmax.f32 %v785_v48, %v786_v55  ;;  %v797_v0 = vmax.f32 %v795_v49, %v796_v56  ;;  %v1468_v1 = vpop.f32.mrb[24].mxu0 }
 0x1a5   : > { %v853_v2 = vadd.f32 %v2070_v63, %v794_v58  ;;  %v805_v3 = vrot.slane %v804_v59, 2  ;;  %v694_v4 = vpop.f32.mrb[25].mxu0 }
 0x1a6   : > { %v852_v5 = vadd.f32 %v2070_v63, %v787_v62  ;;  %v798_v6 = vrot.slane %v797_v0, 2  ;;  %v1469_v7 = vpop.f32.mrb[26].mxu0  ;;  %v953_v8 = vsel %vm952_vm5, %v951_v61, %v950_v53 }
 0x1a7   : > { %v869_v10 = vpack.c.bf16 %v853_v2, %v853_v2  ;;  %v1142_v11 = vrot.slane %v853_v2, 7  ;;  %v806_v12 = vmax.f32 %v804_v59, %v805_v3  ;;  %v816_v13 = vmax.f32 %v1468_v1, %v1469_v7  ;;  %v697_v14 = vpop.f32.mrb[27].mxu0 }
 0x1a8   : > { %v868_v15 = vpack.c.bf16 %v852_v5, %v852_v5  ;;  %v799_v16 = vmax.f32 %v797_v0, %v798_v6  ;;  %v809_v17 = vmax.f32 %v694_v4, %v697_v14  ;;  %v2098_v18 = vsel %vm955_vm6, %v954_v9, %v953_v8 }
 0x1a9   : > { %v929_v19 = vunpack.c.l.b16 %v869_v10  ;;  %v1143_v20 = vsel %vm937_vm0, %v1142_v11, %v852_v5  ;;  %v807_v21 = vrot.slane %v806_v12, 1  ;;  %v817_v22 = vrot.slane %v816_v13, 4 }
 0x1aa   : > { %v928_v23 = vunpack.c.l.b16 %v868_v15  ;;  %v800_v24 = vrot.slane %v799_v16, 1  ;;  %v810_v25 = vrot.slane %v809_v17, 4 }
 0x1ab   : > { %v957_v26 = vrot.slane %v929_v19, 7  ;;  %v808_v27 = vmax.f32 %v806_v12, %v807_v21  ;;  %v818_v28 = vmax.f32 %v816_v13, %v817_v22 }
 0x1ac   : > { %v801_v29 = vmax.f32 %v799_v16, %v800_v24  ;;  %v811_v30 = vmax.f32 %v809_v17, %v810_v25  ;;  %v1472_v31 = vpop.f32.mrb[28].mxu0 }
 0x1ad   : > { %v958_v32 = vsel %vm937_vm0, %v957_v26, %v928_v23  ;;  %v855_v33 = vadd.f32 %v2070_v63, %v808_v27  ;;  %v819_v34 = vrot.slane %v818_v28, 2  ;;  %v710_v35 = vpop.f32.mrb[29].mxu0 }
 0x1ae   : > { %v854_v36 = vadd.f32 %v2070_v63, %v801_v29  ;;  %v812_v37 = vrot.slane %v811_v30, 2  ;;  %v1473_v38 = vpop.f32.mrb[30].mxu0 }
 0x1af   : > { %v871_v39 = vpack.c.bf16 %v855_v33, %v855_v33  ;;  %v820_v40 = vmax.f32 %v818_v28, %v819_v34  ;;  %v830_v41 = vmax.f32 %v1472_v31, %v1473_v38  ;;  %v713_v42 = vpop.f32.mrb[31].mxu0  ;;  %v1146_v48 = vrot.slane %v855_v33, 5 }
 0x1b0   : > { %v870_v43 = vpack.c.bf16 %v854_v36, %v854_v36  ;;  %v1144_v44 = vrot.slane %v854_v36, 6  ;;  %v813_v45 = vmax.f32 %v811_v30, %v812_v37  ;;  %v823_v46 = vmax.f32 %v710_v35, %v713_v42  ;;  %v892_v42 = vld [vmem:[%s369_s1] sm:$0x3] }
 0x1b1   : > { %v931_v47 = vunpack.c.l.b16 %v871_v39  ;;  %v821_v49 = vrot.slane %v820_v40, 1  ;;  %v831_v50 = vrot.slane %v830_v41, 4  ;;  %v894_v39 = vlaneseq }
 0x1b2   : > { %v930_v51 = vunpack.c.l.b16 %v870_v43  ;;  %v1145_v52 = vsel %vm940_vm1, %v1144_v44, %v1143_v20  ;;  %v814_v53 = vrot.slane %v813_v45, 1  ;;  %v824_v54 = vrot.slane %v823_v46, 4 }
 0x1b3   : > { %v822_v55 = vmax.f32 %v820_v40, %v821_v49  ;;  %v1147_v56 = vsel %vm943_vm2, %v1146_v48, %v1145_v52  ;;  %v832_v57 = vmax.f32 %v830_v41, %v831_v50  ;;  %v961_v62 = vrot.slane %v931_v47, 5 }
 0x1b4   : > { %v959_v58 = vrot.slane %v930_v51, 6  ;;  %v815_v59 = vmax.f32 %v813_v45, %v814_v53  ;;  %v825_v61 = vmax.f32 %v823_v46, %v824_v54  ;;  %v895_v40 = vshrl.u32 %v894_v39, 7 }
 0x1b5   : > { %v857_v0 = vadd.f32 %v2070_v63, %v822_v55  ;;  %v833_v1 = vrot.slane %v832_v57, 2 }
 0x1b6   : > { %v960_v2 = vsel %vm940_vm1, %v959_v58, %v958_v32  ;;  %v856_v3 = vadd.f32 %v2070_v63, %v815_v59  ;;  %v826_v4 = vrot.slane %v825_v61, 2  ;;  %v900_v41 = vsub.s32 1, %v895_v40 }
 0x1b7   : > { %v873_v5 = vpack.c.bf16 %v857_v0, %v857_v0  ;;  %v834_v6 = vmax.f32 %v832_v57, %v833_v1  ;;  %v962_v7 = vsel %vm943_vm2, %v961_v62, %v960_v2  ;;  %v1150_v12 = vrot.slane %v857_v0, 3 }
 0x1b8   : > { %v872_v8 = vpack.c.bf16 %v856_v3, %v856_v3  ;;  %v1148_v9 = vrot.slane %v856_v3, 4  ;;  %v827_v10 = vmax.f32 %v825_v61, %v826_v4  ;;  %v901_v43 = vrot.slane %v892_v42, %v900_v41 }
 0x1b9   : > { %v933_v11 = vunpack.c.l.b16 %v873_v5  ;;  %v835_v13 = vrot.slane %v834_v6, 1  ;;  %v896_v55 = vsub.s32 0, %v895_v40 }
 0x1ba   : > { %v932_v14 = vunpack.c.l.b16 %v872_v8  ;;  %v1149_v15 = vsel %vm946_vm3, %v1148_v9, %v1147_v56  ;;  %v828_v16 = vrot.slane %v827_v10, 1 }
 0x1bb   : > { %v836_v17 = vmax.f32 %v834_v6, %v835_v13  ;;  %v1151_v19 = vsel %vm949_vm4, %v1150_v12, %v1149_v15  ;;  %v965_v22 = vrot.slane %v933_v11, 3  ;;  %v897_v56 = vrot.slane %v892_v42, %v896_v55 }
 0x1bc   : > { %v963_v20 = vrot.slane %v932_v14, 4  ;;  %v829_v21 = vmax.f32 %v827_v10, %v828_v16 }
 0x1bd   : > { %v859_v23 = vadd.f32 %v2070_v63, %v836_v17 }
 0x1be   : > { %v858_v24 = vadd.f32 %v2070_v63, %v829_v21  ;;  %v964_v25 = vsel %vm946_vm3, %v963_v20, %v962_v7 }
 0x1bf   : > { %v875_v26 = vpack.c.bf16 %v859_v23, %v859_v23  ;;  %v966_v27 = vsel %vm949_vm4, %v965_v22, %v964_v25  ;;  %v1154_v30 = vrot.slane %v859_v23, 1 }
 0x1c0   : > { %v874_v28 = vpack.c.bf16 %v858_v24, %v858_v24  ;;  %v1152_v29 = vrot.slane %v858_v24, 2 }
 0x1c1   : > { %v935_v31 = vunpack.c.l.b16 %v875_v26 }
 0x1c2   : > { %v934_v32 = vunpack.c.l.b16 %v874_v28  ;;  %v1153_v33 = vsel %vm952_vm5, %v1152_v29, %v1151_v19 }
 0x1c3   : > { %v1155_v34 = vsel %vm955_vm6, %v1154_v30, %v1153_v33  ;;  %v969_v36 = vrot.slane %v935_v31, 1 }
 0x1c4   : > { %v967_v35 = vrot.slane %v934_v32, 2 }
 0x1c6   : > { %v968_v37 = vsel %vm952_vm5, %v967_v35, %v966_v27 }
 0x1c7   : > { %v970_v63 = vsel %vm955_vm6, %v969_v36, %v968_v37 }
 0x1c8   : > { %v971_v38 = vpack.c.b16 %v970_v63, %v2098_v18 }
 0x1ca   : > { %1086 = vmatmul.mubr.bf16.vlgmr.msra.gmra.mrb[0].mxu1 %v971_v38 }
 0x29d   : > { %v1087_v44 = vpop.f32.mrb[0].mxu1 }
 0x29e   : > { %v1089_v45 = vpop.f32.mrb[1].mxu1  ;;  %v1088_v57 = vadd.f32 %v1087_v44, %v897_v56 }
 0x29f   : > { %v1090_v46 = vadd.f32 %v1089_v45, %v901_v43  ;;  %v1091_v47 = vpop.f32.mrb[2].mxu1 }
 0x2a0   : > { %v1093_v48 = vpop.f32.mrb[3].mxu1  ;;  %v1092_v62 = vadd.f32 %v1091_v47, %v897_v56 }
 0x2a1   : > { %v1391_v49 = vmul.f32 -1.442695, %v1090_v46  ;;  %v1094_v50 = vadd.f32 %v1093_v48, %v901_v43 }
 0x2a3   : > { %1601 = vpow2.f32 %v1391_v49  ;;  %v1392_v18 = vmul.f32 -1.442695, %v1094_v50 }
 0x2a5   : > { %1603 = vpow2.f32 %v1392_v18 }
 0x2ad   : > { %v1602_v51 = vpop.eup %1601 }
 0x2ae   : > { %v1102_v52 = vadd.f32 1.0, %v1602_v51 }
 0x2af   : > { %v1604_v53 = vpop.eup %1603 }
 0x2b0   : > { %1605 = vrcp.f32 %v1102_v52  ;;  %v1103_v54 = vadd.f32 1.0, %v1604_v53 }
 0x2b2   : > { %1607 = vrcp.f32 %v1103_v54 }
 0x2ba   : > { %v1606_v58 = vpop.eup %1605 }
 0x2bb   : > { %v1108_v59 = vmul.f32 %v1606_v58, %v1088_v57  ;;  %v1110_v61 = vsub.f32 1.0, %v1606_v58 }
 0x2bc   : > { %v1608_v0 = vpop.eup %1607 }
 0x2bd   : > { %v1158_v1 = vmul.f32 %v2092_v60, %v1110_v61  ;;  %v1109_v2 = vmul.f32 %v1608_v0, %v1092_v62  ;;  %v1111_v3 = vsub.f32 1.0, %v1608_v0 }
 0x2bf   : > { %v1160_v4 = vadd.f32 %v1158_v1, %v1108_v59  ;;  %v1159_v5 = vmul.f32 %v1155_v34, %v1111_v3 }
 0x2c1   : > { %v1161_v6 = vadd.f32 %v1159_v5, %v1109_v2  ;;  %1162 = vst [vmem:[%s361_s0] sm:$0xff] %v1160_v4 }
 0x2c3   : > { %1163 = vst [vmem:[%s361_s0 + $0x8] sm:$0xff] %v1161_v6 }
 0x2c4   : > { %1712 = shalt.err (!%p1709_p11)
}
 0x2c5   : > { %s1713_s17 = scalar_lea.hbm %s2131_s11, 256  ;;  %s1717_s13 = scalar_lea.hbm %s2187_s5, 512 }
 0x2c6   : > { %p1714_p7 = scmp.ne.s32.totalorder %s2131_s11, %s1713_s17  ;;  %p1718_p2 = scmp.lt.u32.totalorder %s2131_s11, %s2187_s5 }
 0x2c7   : > { %p1719_p1 = scmp.lt.u32.totalorder %s1717_s13, %s1713_s17  ;;  %p1721_p6 = scmp.lt.u32.totalorder %s1713_s17, %s2131_s11 }
 0x2c8   : > { %p1715_p3 = pnand %p1714_p7, %p2219_p8 }
 0x2c9   : > { %p1720_p0 = por %p1719_p1, %p1718_p2 }
 0x2ca   : > { %p1716_p5 = pneg %p1715_p3 }
 0x2cb   : > { %p1722_p9 = por %p1721_p6, %p1720_p0 }
 0x2cd   : > { %p1723_p12 = pnand %p1722_p9, %p1716_p5 }
 0x2cf   : > { %1726 = shalt.err (!%p1723_p12)
}
 0x2d0   : > { %s1796_s28 = smov 128   ;;  %s1797_s12 = smov 8  }
 0x2d1   : > { %1480 = dma.vmem_to_hbm [thread:$0]  (%p2219_p8), %s2133_s15, 256, %s2131_s11, %s1165_s25, %s1796_s28, %s1796_s28, %s1797_s12  }
 0x2d2 PF: > { %s2220_s23 = sld [smem:[#allocation14_spill]]  ;;  %s1195_s1 = sand.u32 1, %s1765_s18  }
 0x2d3   : > { %p2221_p4 = scmp.ne.s32.totalorder %s2208_s8, 0  ;;  %s1196_s22 = scalar_lea.sflag [#allocation4], %s1195_s1 }
 0x2d8   : > { %p2222_p10 = scmp.ge.s32.totalorder %s2220_s23, 2 }
 0x2da   : > { %p1493_p13 = pnand %p2222_p10, %p2221_p4 }
 0x2dc   : > { %1760 = dma.done.wait (!%p1493_p13), %s1196_s22, 256  }
 0x2dd   : > { %1762 = vsyncadd (!%p1493_p13), %s1196_s22, 4294967040  ;;  %s24_s23 = sadd.s32 1, %s2220_s23   ;;  %s2223_s9 = sld [smem:[#allocation12_spill]] }
 0x2de   : > { %p21_p11 = scmp.ge.s32.totalorder %s24_s23, 4   ;;  %s2224_s20 = sld [smem:[#allocation16_spill]] }
 0x2df   : > { %s2225_s21 = sld [smem:[#allocation13_spill]]  ;;  %s2226_s22 = sld [smem:[#allocation15_spill]] }
 0x2e0   : > { %s2227_s18 = smov %s1769_s19  ;;  %23 = sbr.rel (!%p21_p11) target bundleno = 11 (0xb), region = 115 }
 0x2e3   : > { %s2228_s19 = smov %s2223_s9 }
 0x2e7   :  { %1201 = vsyncpa [#allocation3], 1 }
 0x2e8   :  { %1203 = vsyncpa [#allocation3 + $0x1], 1 }
 0x2e9   :  { %1204 = vsyncpa [#allocation6], 1 }
 0x2ea   :  { %1206 = vsyncpa [#allocation6 + $0x1], 1 }
 0x2eb   :  { %1207 = vsyncpa [#allocation4], 1 }
 0x2ec   :  { %1209 = vsyncpa [#allocation4 + $0x1], 1 }

</bundles_post_ra>
